<compile_context>
chip_gen: v6e
topology: v6e:2x2x1
jax: 0.10.0
libtpu: 0.0.40
codegen_flags: <defaults>
</compile_context>

<pallas_src>
import jax
import jax.numpy as jnp
from jax.experimental import pallas as pl
from jax.experimental.pallas import tpu as pltpu


def _round_up(x: int, m: int) -> int:
    return ((x + m - 1) // m) * m


def temp_scaled_matmul_kernel(temp_ref, x_ref, w_ref, b_ref, o_ref, acc_ref):
    """Computes one (tm, tn) output tile; K is reduced over grid axis 2.

    temp_ref: SMEM (1,)      f32  -- calibration temperature (scalar prefetch)
    x_ref:    VMEM (tm, tk)  bf16
    w_ref:    VMEM (tk, tn)  bf16
    b_ref:    VMEM (1,  tn)  f32
    o_ref:    VMEM (tm, tn)  f32
    acc_ref:  VMEM (tm, tn)  f32 scratch accumulator
    """
    k = pl.program_id(2)

    @pl.when(k == 0)
    def _():
        acc_ref[...] = jnp.zeros_like(acc_ref)

    acc_ref[...] += jnp.dot(x_ref[...], w_ref[...],
                            preferred_element_type=jnp.float32)

    @pl.when(k == pl.num_programs(2) - 1)
    def _():
        inv_t = 1.0 / temp_ref[0]                 # scalar read from SMEM
        o_ref[...] = (acc_ref[...] + b_ref[...]) * inv_t


@jax.jit
def model_with_temperature_forward(x, w, b, calibration_temperature):
    """Fused (x @ W + b) / T on TPU via a tiled Pallas kernel.

    x: [B, H] (any float dtype), w: [H, C], b: [C], T: scalar.
    Returns float32 [B, C].
    """
    B, H = x.shape
    H2, C = w.shape
    assert H == H2, "x and W contraction dims must match"

    # Tile sizes: lane dims multiples of 128, sublane dims multiples of 8.
    # Clamped down for small problems so a tiny batch still makes one tile.
    tm = min(256, _round_up(B, 8))
    tk = min(512, _round_up(H, 128))
    tn = min(512, _round_up(C, 128))

    # Pad to tile multiples (zeros are exact for matmul / bias add).
    Mp, Kp, Np = _round_up(B, tm), _round_up(H, tk), _round_up(C, tn)

    x_bf = x.astype(jnp.bfloat16)
    w_bf = w.astype(jnp.bfloat16)
    b_f32 = b.astype(jnp.float32).reshape(1, C)

    if (Mp, Kp) != (B, H):
        x_bf = jnp.pad(x_bf, ((0, Mp - B), (0, Kp - H)))
    if (Kp, Np) != (H, C):
        w_bf = jnp.pad(w_bf, ((0, Kp - H), (0, Np - C)))
    if Np != C:
        b_f32 = jnp.pad(b_f32, ((0, 0), (0, Np - C)))

    temp = jnp.asarray(calibration_temperature, jnp.float32).reshape((1,))

    grid = (Mp // tm, Np // tn, Kp // tk)

    out_p = pl.pallas_call(
        temp_scaled_matmul_kernel,
        out_shape=jax.ShapeDtypeStruct((Mp, Np), jnp.float32),
        grid_spec=pltpu.PrefetchScalarGridSpec(
            num_scalar_prefetch=1,               # temperature -> SMEM
            grid=grid,
            in_specs=[
                pl.BlockSpec((tm, tk), lambda i, j, k, temp: (i, k)),  # x
                pl.BlockSpec((tk, tn), lambda i, j, k, temp: (k, j)),  # W
                pl.BlockSpec((1, tn), lambda i, j, k, temp: (0, j)),   # bias
            ],
            out_specs=pl.BlockSpec((tm, tn), lambda i, j, k, temp: (i, j)),
            scratch_shapes=[pltpu.VMEM((tm, tn), jnp.float32)],
        ),
        compiler_params=pltpu.CompilerParams(
            dimension_semantics=("parallel", "parallel", "arbitrary")),
        cost_estimate=pl.CostEstimate(
            flops=2 * Mp * Kp * Np,
            bytes_accessed=Mp * Kp * 2 + Kp * Np * 2 + Np * 4 + Mp * Np * 4,
            transcendentals=0),
    )(temp, x_bf, w_bf, b_f32)

    # Slice away the padding (no-op when already aligned).
    return out_p[:B, :C]


def _reference(x, w, b, t):
    # Matches the kernel's numerics: bf16 MXU inputs, f32 accumulation.
    logits = jnp.dot(x.astype(jnp.bfloat16), w.astype(jnp.bfloat16),
                     preferred_element_type=jnp.float32) + b.astype(jnp.float32)
    return logits / jnp.float32(t)


if __name__ == "__main__":
    calibration_temperature = 1.5  # nn.Parameter(torch.ones(1) * T)

    # --- Test 1: tiny shapes consistent with the module (batch=8, hidden=32,
    #             classes=16).  Exercises the padding path (single-tile grid).
    B, H, C = 8, 32, 16
    key = jax.random.PRNGKey(0)
    kx, kw, kb = jax.random.split(key, 3)
    x = jax.random.normal(kx, (B, H), dtype=jnp.float32)
    w = jax.random.normal(kw, (H, C), dtype=jnp.float32) * 0.1
    b = jax.random.normal(kb, (C,), dtype=jnp.float32) * 0.1

    out = jax.block_until_ready(
        model_with_temperature_forward(x, w, b, calibration_temperature))
    ref = _reference(x, w, b, calibration_temperature)
    assert out.shape == (B, C) and out.dtype == jnp.float32
    assert jnp.allclose(out, ref, atol=1e-3, rtol=1e-3)

    # --- Test 2: larger shapes that exercise the multi-tile grid
    #             (M, N parallel tiles + K reduction across grid steps).
    B2, H2, C2 = 384, 640, 384
    kx2, kw2, kb2 = jax.random.split(jax.random.PRNGKey(1), 3)
    x2 = jax.random.normal(kx2, (B2, H2), dtype=jnp.float32)
    w2 = jax.random.normal(kw2, (H2, C2), dtype=jnp.float32) * 0.05
    b2 = jax.random.normal(kb2, (C2,), dtype=jnp.float32) * 0.1

    out2 = jax.block_until_ready(
        model_with_temperature_forward(x2, w2, b2, calibration_temperature))
    ref2 = _reference(x2, w2, b2, calibration_temperature)
    assert out2.shape == (B2, C2) and out2.dtype == jnp.float32
    assert jnp.allclose(out2, ref2, atol=2e-2, rtol=2e-2)

    print("KERNEL_OK")
</pallas_src>

<mosaic_0001>
module attributes {stable_mosaic.version = 11 : i64} {
  func.func @temp_scaled_matmul_kernel(%arg0: i32, %arg1: i32, %arg2: i32, %arg3: memref<1xf32, #tpu.memory_space<smem>>, %arg4: memref<8x128xbf16, #tpu.memory_space<vmem>>, %arg5: memref<128x128xbf16, #tpu.memory_space<vmem>>, %arg6: memref<1x128xf32, #tpu.memory_space<vmem>>, %arg7: memref<8x128xf32, #tpu.memory_space<vmem>>, %arg8: memref<8x128xf32, #tpu.memory_space<vmem>>) attributes {dimension_semantics = [#tpu.dimension_semantics<parallel>, #tpu.dimension_semantics<parallel>, #tpu.dimension_semantics<arbitrary>], iteration_bounds = array<i64: 1, 1, 1>, scalar_prefetch = 1 : i64, scratch_operands = 1 : i64, tpu.core_type = #tpu.core_type<tc>, window_params = [{transform_indices = @transform_0, window_bounds = array<i64: 8, 128>}, {transform_indices = @transform_1, window_bounds = array<i64: 128, 128>}, {transform_indices = @transform_2, window_bounds = array<i64: 1, 128>}, {transform_indices = @transform_3, window_bounds = array<i64: 8, 128>}]} {
    %c0_i32 = arith.constant 0 : i32
    %0 = arith.cmpi eq, %arg2, %c0_i32 : i32
    %1 = arith.extui %0 : i1 to i32
    %c0_i32_0 = arith.constant 0 : i32
    %2 = arith.cmpi ne, %1, %c0_i32_0 : i32
    scf.if %2 {
      %cst_10 = arith.constant 0.000000e+00 : f32
      %12 = vector.broadcast %cst_10 : f32 to vector<8x128xf32>
      %c0_11 = arith.constant 0 : index
      %c0_12 = arith.constant 0 : index
      %13 = vector.load %arg8[%c0_11, %c0_12] : memref<8x128xf32, #tpu.memory_space<vmem>>, vector<8x128xf32>
      tpu.vector_store %arg8[%c0_11, %c0_12], %12 {strides = array<i32>} : memref<8x128xf32, #tpu.memory_space<vmem>>, vector<8x128xf32>,
    } else {
    }
    %c0 = arith.constant 0 : index
    %c0_1 = arith.constant 0 : index
    %3 = vector.load %arg8[%c0, %c0_1] : memref<8x128xf32, #tpu.memory_space<vmem>>, vector<8x128xf32>
    %c0_2 = arith.constant 0 : index
    %c0_3 = arith.constant 0 : index
    %4 = vector.load %arg4[%c0_2, %c0_3] : memref<8x128xbf16, #tpu.memory_space<vmem>>, vector<8x128xbf16>
    %c0_4 = arith.constant 0 : index
    %c0_5 = arith.constant 0 : index
    %5 = vector.load %arg5[%c0_4, %c0_5] : memref<128x128xbf16, #tpu.memory_space<vmem>>, vector<128x128xbf16>
    %cst = arith.constant dense<0.000000e+00> : vector<8x128xf32>
    %6 = tpu.matmul %4, %5, %cst {dimension_numbers = #tpu.dot_dimension_numbers<[1], [0], [0], [1], [0, 0, 1, 1], [], []>} : vector<8x128xbf16>, vector<128x128xbf16>, vector<8x128xf32> -> vector<8x128xf32>
    %7 = arith.addf %3, %6 : vector<8x128xf32>
    %c0_6 = arith.constant 0 : index
    %c0_7 = arith.constant 0 : index
    %8 = vector.load %arg8[%c0_6, %c0_7] : memref<8x128xf32, #tpu.memory_space<vmem>>, vector<8x128xf32>
    tpu.vector_store %arg8[%c0_6, %c0_7], %7 {strides = array<i32>} : memref<8x128xf32, #tpu.memory_space<vmem>>, vector<8x128xf32>,
    %c0_i32_8 = arith.constant 0 : i32
    %9 = arith.cmpi eq, %arg2, %c0_i32_8 : i32
    %10 = arith.extui %9 : i1 to i32
    %c0_i32_9 = arith.constant 0 : i32
    %11 = arith.cmpi ne, %10, %c0_i32_9 : i32
    scf.if %11 {
      %c0_10 = arith.constant 0 : index
      %12 = memref.load %arg3[%c0_10] : memref<1xf32, #tpu.memory_space<smem>>
      %cst_11 = arith.constant 1.000000e+00 : f32
      %13 = arith.divf %cst_11, %12 : f32
      %c0_12 = arith.constant 0 : index
      %c0_13 = arith.constant 0 : index
      %14 = vector.load %arg8[%c0_12, %c0_13] : memref<8x128xf32, #tpu.memory_space<vmem>>, vector<8x128xf32>
      %c0_14 = arith.constant 0 : index
      %c0_15 = arith.constant 0 : index
      %15 = vector.load %arg6[%c0_14, %c0_15] : memref<1x128xf32, #tpu.memory_space<vmem>>, vector<1x128xf32>
      %16 = vector.broadcast %15 : vector<1x128xf32> to vector<8x128xf32>
      %17 = arith.addf %14, %16 : vector<8x128xf32>
      %18 = vector.broadcast %13 : f32 to vector<8x128xf32>
      %19 = arith.mulf %17, %18 : vector<8x128xf32>
      %c0_16 = arith.constant 0 : index
      %c0_17 = arith.constant 0 : index
      %20 = vector.load %arg7[%c0_16, %c0_17] : memref<8x128xf32, #tpu.memory_space<vmem>>, vector<8x128xf32>
      tpu.vector_store %arg7[%c0_16, %c0_17], %19 {strides = array<i32>} : memref<8x128xf32, #tpu.memory_space<vmem>>, vector<8x128xf32>,
    } else {
    }
    return
  }
  func.func @transform_0(%arg0: i32, %arg1: i32, %arg2: i32, %arg3: memref<1xf32, #tpu.memory_space<smem>>) -> (i32, i32) {
    %c0_i32 = arith.constant 0 : i32
    return %arg0, %arg2 : i32, i32
  }
  func.func @transform_1(%arg0: i32, %arg1: i32, %arg2: i32, %arg3: memref<1xf32, #tpu.memory_space<smem>>) -> (i32, i32) {
    %c0_i32 = arith.constant 0 : i32
    return %arg2, %arg1 : i32, i32
  }
  func.func @transform_2(%arg0: i32, %arg1: i32, %arg2: i32, %arg3: memref<1xf32, #tpu.memory_space<smem>>) -> (i32, i32) {
    %c0_i32 = arith.constant 0 : i32
    %c0_i32_0 = arith.constant 0 : i32
    return %c0_i32, %arg1 : i32, i32
  }
  func.func @transform_3(%arg0: i32, %arg1: i32, %arg2: i32, %arg3: memref<1xf32, #tpu.memory_space<smem>>) -> (i32, i32) {
    %c0_i32 = arith.constant 0 : i32
    return %arg0, %arg1 : i32, i32
  }
}

</mosaic_0001>

<bundles_post_ra>
// kernel: model_with_temperature_forward.1
= control target key start
LH: loop header
LB: loop body
LE: loop exit
PB: predicated region body
PF: predicated region fallthrough
CT: control target
= control target key end

     0   :  { %v239_v2 = vmov 0.0   ;;  %vm240_vm0 = vmmov 0   ;;  %s303_s0 = inlined_call_operand.<no memory space> [shape: f32[1], index: 0, kind: input, shape index: {}]   ;;  %s304_s1 = inlined_call_operand.vmem [shape: bf16[8,128], index: 1, kind: input, shape index: {}]   ;;  %s305_s2 = inlined_call_operand.vmem [shape: bf16[128,128], index: 2, kind: input, shape index: {}]   ;;  %s306_s3 = inlined_call_operand.vmem [shape: f32[1,128], index: 3, kind: input, shape index: {}]   ;;  %s307_s4 = inlined_call_operand.hbm [shape: f32[8,128], index: 4, kind: output, shape index: {}]  }
   0x1   :  { %v207_v0 = vld [vmem:[%s305_s2 + $0x38] sm:$0xff]   ;;  %v135_v1 = vstv %s303_s0  ;;  %182 = vmatprep.subr.bf16.mxu0 %v239_v2  ;;  %v208_v3 = vld [vmem:[%s305_s2 + $0x30] sm:$0xff]   ;;  %198 = vmatprep.mubr.msk.bf16.mxu0 %vm240_vm0, %v239_v2  ;;  %v209_v4 = vld [vmem:[%s305_s2 + $0x28] sm:$0xff]  }
   0x2   :  { %215 = vrcp.f32 %v135_v1  ;;  %183 = vmatpush3.bf16.msra.mxu0 %v207_v0 }
   0x3   :  { %184 = vmatprep.subr.bf16.mxu0 %v239_v2 }
   0x6   :  { %185 = vmatpush3.bf16.msra.mxu0 %v208_v3 }
   0x7   :  { %186 = vmatprep.subr.bf16.mxu0 %v239_v2 }
   0x8   :  { %10 = vsyncpa [#allocation6], 0  ;;  %v210_v5 = vld [vmem:[%s305_s2 + $0x20] sm:$0xff]   ;;  %v211_v7 = vld [vmem:[%s305_s2 + $0x18] sm:$0xff]   ;;  %s241_s11 = smov [#allocation5]  }
   0x9   :  { %v212_v8 = vld [vmem:[%s305_s2 + $0x10] sm:$0xff]   ;;  %v213_v9 = vld [vmem:[%s305_s2 + $0x8] sm:$0xff]   ;;  %v214_v10 = vld [vmem:[%s305_s2] sm:$0xff]   ;;  %s156_s12 = sshll.u32 %s241_s11, 4  ;;  %s157_s12 = int_to_ptr.vmem [resolvable:$true] %s156_s12 }
   0xa   :  { %187 = vmatpush3.bf16.msra.mxu0 %v209_v4  ;;  %v24_v11 = vld [vmem:[%s304_s1] sm:$0xf]  ;;  %s217_s2 = scalar_lea.vmem %s157_s12, 128  ;;  %p222_p1 = scmp.lt.s32.totalorder %s157_s12, %s157_s12 }
   0xb   :  { %188 = vmatprep.subr.bf16.mxu0 %v239_v2  ;;  %v172_v12 = vld [vmem:[%s306_s3] ss:$0 sm:$0xff]  ;;  %p218_p0 = scmp.ne.s32.totalorder %s157_s12, %s217_s2  ;;  %p223_p2 = scmp.lt.s32.totalorder %s217_s2, %s217_s2 }
   0xd   :  { %p224_p3 = por %p223_p2, %p222_p1 }
   0xe   :  { %189 = vmatpush3.bf16.msra.mxu0 %v210_v5 }
   0xf   :  { %v216_v6 = vpop.eup %215  ;;  %190 = vmatprep.subr.bf16.mxu0 %v239_v2  ;;  %p225_p4 = pnand %p224_p3, %p218_p0 }
  0x10   :  { %202 = vpush %v216_v6 }
  0x12   :  { %191 = vmatpush3.bf16.msra.mxu0 %v211_v7 }
  0x13   :  { %192 = vmatprep.subr.bf16.mxu0 %v239_v2 }
  0x16   :  { %193 = vmatpush3.bf16.msra.mxu0 %v212_v8 }
  0x17   :  { %194 = vmatprep.subr.bf16.mxu0 %v239_v2 }
  0x1a   :  { %195 = vmatpush3.bf16.msra.mxu0 %v213_v9 }
  0x1b   :  { %196 = vmatprep.subr.bf16.mxu0 %v239_v2 }
  0x1e   :  { %197 = vmatpush3.bf16.msra.mxu0 %v214_v10 }
  0x21   :  { %199 = vmatmul.mubr.bf16.vlgmr.msra.gmra.mxu0 %v24_v11 }
  0x41   :  { %s203_s8 = spop %202 }
  0x42   :  { %v147_v14 = vstv %s203_s8 }
  0xe1   :  { %v123_v13 = vpop.f32.mrf.mxu0 }
  0xe2   :  { %v146_v15 = vadd.f32 %v172_v12, %v123_v13 }
  0xe3   :  { %v200_v16 = vpop.f32.mrf.mxu0 }
  0xe4   :  { %v148_v17 = vmul.f32 %v147_v14, %v146_v15 }
  0xe5   :  { %v126_v18 = vpop.f32.mrf.mxu0 }
  0xe6   :  { %149 = vst [vmem:[#allocation5] sm:$0xff] %v148_v17 }
  0xe7   :  { %v201_v19 = vpop.f32.mrf.mxu0 }
  0xe8   :  { %228 = shalt.err (!%p225_p4)
}
  0xe9   :  { %159 = dma.vmem_to_hbm [thread:$0]  %s157_s12, 128, %s307_s4, [#allocation6]  }
  0xea   :  { %237 = dma.done.wait [#allocation6], 128  }
  0xeb   :  { %238 = vsyncadd [#allocation6], 4294967168 }
  0xec   :  { %163 = vsyncpa [#allocation6], 1 }

</bundles_post_ra>
